<compile_context>
chip_gen: v5e
topology: v5e:2x2
jax: 0.10.0
libtpu: 0.0.40
codegen_flags: <defaults>
</compile_context>

<pallas_src>
import jax
import jax.numpy as jnp
from jax.experimental import pallas as pl
from jax.experimental.pallas import tpu as pltpu

RAD2DEG = 57.29578

# Per-block byte budget for the (rows, W) f32 input tile.  The output tile is
# the same size, both are double-buffered by the BlockSpec pipeline, and ~10
# block-sized temporaries may be live in VMEM during the elementwise body.
_BLOCK_BUDGET_BYTES = 1 * 1024 * 1024


def _make_aspect_kernel(H, use_roll):
    """Build the kernel body. H = image height, use_roll = shifts via XLU roll."""

    def kernel(w1_ref, w2_ref, bias_ref, x_ref, out_ref):
        TR, W = x_ref.shape          # TR = (images per block) * H
        x = x_ref[...]               # (TR, W) f32

        # --- shifted-operand helpers -----------------------------------------
        # roll path: wrap-around values are masked below.
        # concat path: zeros are inserted directly at the block edges.
        def shift_down(a):           # result[i, j] = a[i-1, j]
            if use_roll:
                return pltpu.roll(a, 1, axis=0)
            return jnp.concatenate(
                [jnp.zeros((1, W), a.dtype), a[:TR - 1, :]], axis=0)

        def shift_up(a):             # result[i, j] = a[i+1, j]
            if use_roll:
                return pltpu.roll(a, TR - 1, axis=0)
            return jnp.concatenate(
                [a[1:, :], jnp.zeros((1, W), a.dtype)], axis=0)

        def shift_right(a):          # result[i, j] = a[i, j-1]
            if use_roll:
                return pltpu.roll(a, 1, axis=1)
            return jnp.concatenate(
                [jnp.zeros((TR, 1), a.dtype), a[:, :W - 1]], axis=1)

        def shift_left(a):           # result[i, j] = a[i, j+1]
            if use_roll:
                return pltpu.roll(a, W - 1, axis=1)
            return jnp.concatenate(
                [a[:, 1:], jnp.zeros((TR, 1), a.dtype)], axis=1)

        # --- boundary masks: realize the conv's zero padding ------------------
        # Masks are thin (TR,1)/(1,W) strips broadcast by jnp.where.  They are
        # only needed where a shifted operand carries a wrong value:
        #   * roll path: wrap-around at every block edge,
        #   * concat path: only image boundaries *inside* the block (the concat
        #     already zero-fills the block edges).
        need_vmask = use_roll or (TR != H)
        need_hmask = use_roll

        if need_vmask:
            row_in_img = jax.lax.broadcasted_iota(jnp.int32, (TR, 1), 0) % H
            top = row_in_img == 0            # "above" neighbor is the zero pad
            bot = row_in_img == H - 1        # "below" neighbor is the zero pad
            mask_top = lambda a: jnp.where(top, 0.0, a)
            mask_bot = lambda a: jnp.where(bot, 0.0, a)
        else:
            mask_top = mask_bot = lambda a: a

        if need_hmask:
            col = jax.lax.broadcasted_iota(jnp.int32, (1, W), 1)
            lft = col == 0                   # "left" neighbor is the zero pad
            rgt = col == W - 1               # "right" neighbor is the zero pad
            mask_lft = lambda a: jnp.where(lft, 0.0, a)
            mask_rgt = lambda a: jnp.where(rgt, 0.0, a)
        else:
            mask_lft = mask_rgt = lambda a: a

        # Row-shifted operands (vertical taps), zeros outside each image.
        r_up = mask_top(shift_down(x))       # x[i-1, j]
        r_dn = mask_bot(shift_up(x))         # x[i+1, j]

        bias = bias_ref[0]

        # Per-column weighted vertical sums:
        #   c_kj[i, j] = sum_ki w[ki, kj] * x[i+ki-1, j]
        def vsum(w_ref, kj):
            return w_ref[0, kj] * r_up + w_ref[1, kj] * x + w_ref[2, kj] * r_dn

        c0, c1, c2 = vsum(w1_ref, 0), vsum(w1_ref, 1), vsum(w1_ref, 2)
        d0, d1, d2 = vsum(w2_ref, 0), vsum(w2_ref, 1), vsum(w2_ref, 2)

        # Horizontal taps: dx[i, j] = c0[i, j-1] + c1[i, j] + c2[i, j+1] + bias
        dx = bias + c1 + mask_lft(shift_right(c0)) + mask_rgt(shift_left(c2))
        dy = bias + d1 + mask_lft(shift_right(d0)) + mask_rgt(shift_left(d2))

        aspect = RAD2DEG * jnp.arctan2(dy, -dx)
        # where(a > 90, 360 - a + 90, 90 - a)  ==  where(a > 90, 450, 90) - a
        aspect = jnp.where(aspect > 90.0, 450.0, 90.0) - aspect
        out_ref[...] = aspect.astype(out_ref.dtype)

    return kernel


def _pick_images_per_block(B, H, W):
    """Whole images per row-block: fits the VMEM budget, divides B, and keeps
    the block's sublane extent a multiple of 8 (or the full array extent)."""
    img_bytes = H * W * 4
    tb = max(1, min(B, _BLOCK_BUDGET_BYTES // max(img_bytes, 1)))
    while B % tb:
        tb -= 1
    if (tb * H) % 8 == 0:
        return tb
    for t in range(tb, B + 1):
        if B % t == 0 and (t * H) % 8 == 0:
            return t
    return B   # block == full array extent is always a legal block shape


def aspect_forward(x, w1, w2, bias):
    """x: (B, 1, H, W) float32 (NCHW, like the PyTorch module)."""
    B, C, H, W = x.shape
    assert C == 1, "Aspect module only supports single-channel input"

    R = B * H
    x2 = x.reshape(R, W)                     # free reshape (row-major), no pad

    tb = _pick_images_per_block(B, H, W)
    TR = tb * H                              # rows per block (whole images)
    grid = (R // TR,)
    # TODO(synk): for single images larger than the VMEM budget, add intra-image
    # row tiling with a 1-row halo (overlapping windows) instead of whole images.

    # Fast path: XLU rotates on an (8,128)-aligned tile; otherwise fall back to
    # concat-with-zeros shifts (trivial for tiny tiles like the 16x16 demo).
    use_roll = (W % 128 == 0) and (TR % 8 == 0)

    kernel = _make_aspect_kernel(H, use_roll)

    out2 = pl.pallas_call(
        kernel,
        out_shape=jax.ShapeDtypeStruct((R, W), jnp.float32),
        grid_spec=pltpu.PrefetchScalarGridSpec(
            num_scalar_prefetch=0,
            grid=grid,
            in_specs=[
                pl.BlockSpec(memory_space=pltpu.MemorySpace.SMEM),  # w1 (3,3)
                pl.BlockSpec(memory_space=pltpu.MemorySpace.SMEM),  # w2 (3,3)
                pl.BlockSpec(memory_space=pltpu.MemorySpace.SMEM),  # bias (1,)
                pl.BlockSpec((TR, W), lambda i: (i, 0)),
            ],
            out_specs=pl.BlockSpec((TR, W), lambda i: (i, 0)),
        ),
        compiler_params=pltpu.CompilerParams(
            dimension_semantics=("parallel",),
            vmem_limit_bytes=32 * 1024 * 1024,
        ),
    )(w1, w2, bias, x2)

    return out2.reshape(B, 1, H, W)          # back to NCHW


def _reference(x, w1, w2, bias):
    """Pure-JAX reference matching the PyTorch forward (generic 3x3 conv)."""
    B, C, H, W = x.shape
    xpad = jnp.pad(x[:, 0], ((0, 0), (1, 1), (1, 1)))
    dx = sum(w1[i, j] * xpad[:, i:i + H, j:j + W]
             for i in range(3) for j in range(3)) + bias[0]
    dy = sum(w2[i, j] * xpad[:, i:i + H, j:j + W]
             for i in range(3) for j in range(3)) + bias[0]
    asp = RAD2DEG * jnp.arctan2(dy, -dx)
    asp = jnp.where(asp > 90.0, 360.0 - asp + 90.0, 90.0 - asp)
    return asp[:, None, :, :]


def _run_case(B, H, W, key):
    # Deterministic parameters (match Aspect.__init__: Sobel/8, zero bias).
    w1 = jnp.array([[-1.0, 0.0, 1.0],
                    [-2.0, 0.0, 2.0],
                    [-1.0, 0.0, 1.0]], dtype=jnp.float32) / 8.0
    w2 = jnp.array([[-1.0, -2.0, -1.0],
                    [0.0,  0.0,  0.0],
                    [1.0,  2.0,  1.0]], dtype=jnp.float32) / 8.0
    bias = jnp.zeros((1,), dtype=jnp.float32)

    x = jax.random.normal(key, (B, 1, H, W), dtype=jnp.float32)

    out = jax.block_until_ready(aspect_forward(x, w1, w2, bias))
    ref = _reference(x, w1, w2, bias)

    assert out.shape == (B, 1, H, W)
    # The aspect mapping has a 0/360-degree wrap exactly at the `> 90` branch
    # boundary; compare as angles so float ordering differences cannot trip it.
    diff = jnp.abs(out - ref)
    diff = jnp.minimum(diff, 360.0 - diff)
    assert bool(jnp.all(diff < 1e-3)), f"mismatch vs reference at {(B, H, W)}"


if __name__ == "__main__":
    key = jax.random.PRNGKey(0)
    k1, k2 = jax.random.split(key)
    _run_case(2, 16, 16, k1)    # unaligned tile -> concat-with-zeros fallback path
    _run_case(2, 16, 128, k2)   # (8,128)-aligned tile -> pltpu.roll fast path
    print("KERNEL_OK")
</pallas_src>

<mosaic_0001>
module attributes {stable_mosaic.version = 11 : i64} {
  func.func @kernel(%arg0: i32, %arg1: memref<3x3xf32, #tpu.memory_space<smem>>, %arg2: memref<3x3xf32, #tpu.memory_space<smem>>, %arg3: memref<1xf32, #tpu.memory_space<smem>>, %arg4: memref<32x16xf32, #tpu.memory_space<vmem>>, %arg5: memref<32x16xf32, #tpu.memory_space<vmem>>) attributes {dimension_semantics = [#tpu.dimension_semantics<parallel>], iteration_bounds = array<i64: 1>, scalar_prefetch = 0 : i64, scratch_operands = 0 : i64, tpu.core_type = #tpu.core_type<tc>, window_params = [{transform_indices = @transform_0, window_bounds = array<i64: 3, 3>}, {transform_indices = @transform_1, window_bounds = array<i64: 3, 3>}, {transform_indices = @transform_2, window_bounds = array<i64: 1>}, {transform_indices = @transform_3, window_bounds = array<i64: 32, 16>}, {transform_indices = @transform_4, window_bounds = array<i64: 32, 16>}]} {
    %c0 = arith.constant 0 : index
    %c0_0 = arith.constant 0 : index
    %0 = vector.load %arg4[%c0, %c0_0] : memref<32x16xf32, #tpu.memory_space<vmem>>, vector<32x16xf32>
    %1 = tpu.iota {dimensions = array<i32: 0>} : vector<32x1xi32>
    %c16_i32 = arith.constant 16 : i32
    %c0_i32 = arith.constant 0 : i32
    %2 = arith.cmpi eq, %c16_i32, %c0_i32 : i32
    %c1_i32 = arith.constant 1 : i32
    %3 = arith.select %2, %c1_i32, %c16_i32 : i32
    %4 = vector.broadcast %3 : i32 to vector<32x1xi32>
    %5 = arith.remsi %1, %4 : vector<32x1xi32>
    %c0_i32_1 = arith.constant 0 : i32
    %6 = vector.broadcast %c0_i32_1 : i32 to vector<32x1xi32>
    %7 = arith.cmpi ne, %5, %6 : vector<32x1xi32>
    %c0_i32_2 = arith.constant 0 : i32
    %8 = vector.broadcast %c0_i32_2 : i32 to vector<32x1xi32>
    %9 = arith.cmpi slt, %5, %8 : vector<32x1xi32>
    %c0_i32_3 = arith.constant 0 : i32
    %10 = arith.cmpi slt, %3, %c0_i32_3 : i32
    %11 = vector.broadcast %10 : i1 to vector<32x1xi1>
    %12 = vector.broadcast %11 : vector<32x1xi1> to vector<32x1xi1>
    %13 = arith.xori %9, %12 : vector<32x1xi1>
    %14 = arith.andi %13, %7 : vector<32x1xi1>
    %15 = vector.broadcast %3 : i32 to vector<32x1xi32>
    %16 = arith.addi %5, %15 : vector<32x1xi32>
    %17 = arith.select %14, %16, %5 : vector<32x1xi1>, vector<32x1xi32>
    %c0_i32_4 = arith.constant 0 : i32
    %18 = vector.broadcast %c0_i32_4 : i32 to vector<32x1xi32>
    %19 = arith.cmpi eq, %17, %18 : vector<32x1xi32>
    %c15_i32 = arith.constant 15 : i32
    %20 = vector.broadcast %c15_i32 : i32 to vector<32x1xi32>
    %21 = arith.cmpi eq, %17, %20 : vector<32x1xi32>
    %cst = arith.constant 0.000000e+00 : f32
    %22 = vector.broadcast %cst : f32 to vector<1x16xf32>
    %23 = vector.extract_strided_slice %0 {offsets = [0, 0], sizes = [31, 16], strides = [1, 1]} : vector<32x16xf32> to vector<31x16xf32>
    %24 = tpu.concatenate %22, %23 in 0 : vector<1x16xf32>, vector<31x16xf32> -> vector<32x16xf32>
    %cst_5 = arith.constant 0.000000e+00 : f32
    %25 = vector.shape_cast %19 : vector<32x1xi1> to vector<32x1xi1>
    %26 = vector.broadcast %25 : vector<32x1xi1> to vector<32x16xi1>
    %27 = vector.broadcast %cst_5 : f32 to vector<32x16xf32>
    %28 = arith.select %26, %27, %24 : vector<32x16xi1>, vector<32x16xf32>
    %29 = vector.extract_strided_slice %0 {offsets = [1, 0], sizes = [31, 16], strides = [1, 1]} : vector<32x16xf32> to vector<31x16xf32>
    %cst_6 = arith.constant 0.000000e+00 : f32
    %30 = vector.broadcast %cst_6 : f32 to vector<1x16xf32>
    %31 = tpu.concatenate %29, %30 in 0 : vector<31x16xf32>, vector<1x16xf32> -> vector<32x16xf32>
    %cst_7 = arith.constant 0.000000e+00 : f32
    %32 = vector.shape_cast %21 : vector<32x1xi1> to vector<32x1xi1>
    %33 = vector.broadcast %32 : vector<32x1xi1> to vector<32x16xi1>
    %34 = vector.broadcast %cst_7 : f32 to vector<32x16xf32>
    %35 = arith.select %33, %34, %31 : vector<32x16xi1>, vector<32x16xf32>
    %c0_8 = arith.constant 0 : index
    %36 = memref.load %arg3[%c0_8] : memref<1xf32, #tpu.memory_space<smem>>
    %c0_9 = arith.constant 0 : index
    %c0_10 = arith.constant 0 : index
    %37 = memref.load %arg1[%c0_9, %c0_10] : memref<3x3xf32, #tpu.memory_space<smem>>
    %38 = vector.broadcast %37 : f32 to vector<32x16xf32>
    %39 = arith.mulf %38, %28 : vector<32x16xf32>
    %c1 = arith.constant 1 : index
    %c0_11 = arith.constant 0 : index
    %40 = memref.load %arg1[%c1, %c0_11] : memref<3x3xf32, #tpu.memory_space<smem>>
    %41 = vector.broadcast %40 : f32 to vector<32x16xf32>
    %42 = arith.mulf %41, %0 : vector<32x16xf32>
    %43 = arith.addf %39, %42 : vector<32x16xf32>
    %c2 = arith.constant 2 : index
    %c0_12 = arith.constant 0 : index
    %44 = memref.load %arg1[%c2, %c0_12] : memref<3x3xf32, #tpu.memory_space<smem>>
    %45 = vector.broadcast %44 : f32 to vector<32x16xf32>
    %46 = arith.mulf %45, %35 : vector<32x16xf32>
    %47 = arith.addf %43, %46 : vector<32x16xf32>
    %c0_13 = arith.constant 0 : index
    %c1_14 = arith.constant 1 : index
    %48 = memref.load %arg1[%c0_13, %c1_14] : memref<3x3xf32, #tpu.memory_space<smem>>
    %49 = vector.broadcast %48 : f32 to vector<32x16xf32>
    %50 = arith.mulf %49, %28 : vector<32x16xf32>
    %c1_15 = arith.constant 1 : index
    %c1_16 = arith.constant 1 : index
    %51 = memref.load %arg1[%c1_15, %c1_16] : memref<3x3xf32, #tpu.memory_space<smem>>
    %52 = vector.broadcast %51 : f32 to vector<32x16xf32>
    %53 = arith.mulf %52, %0 : vector<32x16xf32>
    %54 = arith.addf %50, %53 : vector<32x16xf32>
    %c2_17 = arith.constant 2 : index
    %c1_18 = arith.constant 1 : index
    %55 = memref.load %arg1[%c2_17, %c1_18] : memref<3x3xf32, #tpu.memory_space<smem>>
    %56 = vector.broadcast %55 : f32 to vector<32x16xf32>
    %57 = arith.mulf %56, %35 : vector<32x16xf32>
    %58 = arith.addf %54, %57 : vector<32x16xf32>
    %c0_19 = arith.constant 0 : index
    %c2_20 = arith.constant 2 : index
    %59 = memref.load %arg1[%c0_19, %c2_20] : memref<3x3xf32, #tpu.memory_space<smem>>
    %60 = vector.broadcast %59 : f32 to vector<32x16xf32>
    %61 = arith.mulf %60, %28 : vector<32x16xf32>
    %c1_21 = arith.constant 1 : index
    %c2_22 = arith.constant 2 : index
    %62 = memref.load %arg1[%c1_21, %c2_22] : memref<3x3xf32, #tpu.memory_space<smem>>
    %63 = vector.broadcast %62 : f32 to vector<32x16xf32>
    %64 = arith.mulf %63, %0 : vector<32x16xf32>
    %65 = arith.addf %61, %64 : vector<32x16xf32>
    %c2_23 = arith.constant 2 : index
    %c2_24 = arith.constant 2 : index
    %66 = memref.load %arg1[%c2_23, %c2_24] : memref<3x3xf32, #tpu.memory_space<smem>>
    %67 = vector.broadcast %66 : f32 to vector<32x16xf32>
    %68 = arith.mulf %67, %35 : vector<32x16xf32>
    %69 = arith.addf %65, %68 : vector<32x16xf32>
    %c0_25 = arith.constant 0 : index
    %c0_26 = arith.constant 0 : index
    %70 = memref.load %arg2[%c0_25, %c0_26] : memref<3x3xf32, #tpu.memory_space<smem>>
    %71 = vector.broadcast %70 : f32 to vector<32x16xf32>
    %72 = arith.mulf %71, %28 : vector<32x16xf32>
    %c1_27 = arith.constant 1 : index
    %c0_28 = arith.constant 0 : index
    %73 = memref.load %arg2[%c1_27, %c0_28] : memref<3x3xf32, #tpu.memory_space<smem>>
    %74 = vector.broadcast %73 : f32 to vector<32x16xf32>
    %75 = arith.mulf %74, %0 : vector<32x16xf32>
    %76 = arith.addf %72, %75 : vector<32x16xf32>
    %c2_29 = arith.constant 2 : index
    %c0_30 = arith.constant 0 : index
    %77 = memref.load %arg2[%c2_29, %c0_30] : memref<3x3xf32, #tpu.memory_space<smem>>
    %78 = vector.broadcast %77 : f32 to vector<32x16xf32>
    %79 = arith.mulf %78, %35 : vector<32x16xf32>
    %80 = arith.addf %76, %79 : vector<32x16xf32>
    %c0_31 = arith.constant 0 : index
    %c1_32 = arith.constant 1 : index
    %81 = memref.load %arg2[%c0_31, %c1_32] : memref<3x3xf32, #tpu.memory_space<smem>>
    %82 = vector.broadcast %81 : f32 to vector<32x16xf32>
    %83 = arith.mulf %82, %28 : vector<32x16xf32>
    %c1_33 = arith.constant 1 : index
    %c1_34 = arith.constant 1 : index
    %84 = memref.load %arg2[%c1_33, %c1_34] : memref<3x3xf32, #tpu.memory_space<smem>>
    %85 = vector.broadcast %84 : f32 to vector<32x16xf32>
    %86 = arith.mulf %85, %0 : vector<32x16xf32>
    %87 = arith.addf %83, %86 : vector<32x16xf32>
    %c2_35 = arith.constant 2 : index
    %c1_36 = arith.constant 1 : index
    %88 = memref.load %arg2[%c2_35, %c1_36] : memref<3x3xf32, #tpu.memory_space<smem>>
    %89 = vector.broadcast %88 : f32 to vector<32x16xf32>
    %90 = arith.mulf %89, %35 : vector<32x16xf32>
    %91 = arith.addf %87, %90 : vector<32x16xf32>
    %c0_37 = arith.constant 0 : index
    %c2_38 = arith.constant 2 : index
    %92 = memref.load %arg2[%c0_37, %c2_38] : memref<3x3xf32, #tpu.memory_space<smem>>
    %93 = vector.broadcast %92 : f32 to vector<32x16xf32>
    %94 = arith.mulf %93, %28 : vector<32x16xf32>
    %c1_39 = arith.constant 1 : index
    %c2_40 = arith.constant 2 : index
    %95 = memref.load %arg2[%c1_39, %c2_40] : memref<3x3xf32, #tpu.memory_space<smem>>
    %96 = vector.broadcast %95 : f32 to vector<32x16xf32>
    %97 = arith.mulf %96, %0 : vector<32x16xf32>
    %98 = arith.addf %94, %97 : vector<32x16xf32>
    %c2_41 = arith.constant 2 : index
    %c2_42 = arith.constant 2 : index
    %99 = memref.load %arg2[%c2_41, %c2_42] : memref<3x3xf32, #tpu.memory_space<smem>>
    %100 = vector.broadcast %99 : f32 to vector<32x16xf32>
    %101 = arith.mulf %100, %35 : vector<32x16xf32>
    %102 = arith.addf %98, %101 : vector<32x16xf32>
    %103 = vector.broadcast %36 : f32 to vector<32x16xf32>
    %104 = arith.addf %103, %58 : vector<32x16xf32>
    %cst_43 = arith.constant 0.000000e+00 : f32
    %105 = vector.broadcast %cst_43 : f32 to vector<32x1xf32>
    %106 = vector.extract_strided_slice %47 {offsets = [0, 0], sizes = [32, 15], strides = [1, 1]} : vector<32x16xf32> to vector<32x15xf32>
    %107 = tpu.concatenate %105, %106 in 1 : vector<32x1xf32>, vector<32x15xf32> -> vector<32x16xf32>
    %108 = arith.addf %104, %107 : vector<32x16xf32>
    %109 = vector.extract_strided_slice %69 {offsets = [0, 1], sizes = [32, 15], strides = [1, 1]} : vector<32x16xf32> to vector<32x15xf32>
    %cst_44 = arith.constant 0.000000e+00 : f32
    %110 = vector.broadcast %cst_44 : f32 to vector<32x1xf32>
    %111 = tpu.concatenate %109, %110 in 1 : vector<32x15xf32>, vector<32x1xf32> -> vector<32x16xf32>
    %112 = arith.addf %108, %111 : vector<32x16xf32>
    %113 = vector.broadcast %36 : f32 to vector<32x16xf32>
    %114 = arith.addf %113, %91 : vector<32x16xf32>
    %cst_45 = arith.constant 0.000000e+00 : f32
    %115 = vector.broadcast %cst_45 : f32 to vector<32x1xf32>
    %116 = vector.extract_strided_slice %80 {offsets = [0, 0], sizes = [32, 15], strides = [1, 1]} : vector<32x16xf32> to vector<32x15xf32>
    %117 = tpu.concatenate %115, %116 in 1 : vector<32x1xf32>, vector<32x15xf32> -> vector<32x16xf32>
    %118 = arith.addf %114, %117 : vector<32x16xf32>
    %119 = vector.extract_strided_slice %102 {offsets = [0, 1], sizes = [32, 15], strides = [1, 1]} : vector<32x16xf32> to vector<32x15xf32>
    %cst_46 = arith.constant 0.000000e+00 : f32
    %120 = vector.broadcast %cst_46 : f32 to vector<32x1xf32>
    %121 = tpu.concatenate %119, %120 in 1 : vector<32x15xf32>, vector<32x1xf32> -> vector<32x16xf32>
    %122 = arith.addf %118, %121 : vector<32x16xf32>
    %cst_47 = arith.constant 0.000000e+00 : f32
    %123 = vector.broadcast %cst_47 : f32 to vector<32x16xf32>
    %124 = arith.subf %123, %112 : vector<32x16xf32>
    %125 = math.atan2 %122, %124 : vector<32x16xf32>
    %cst_48 = arith.constant 57.2957802 : f32
    %126 = vector.broadcast %cst_48 : f32 to vector<32x16xf32>
    %127 = arith.mulf %126, %125 : vector<32x16xf32>
    %cst_49 = arith.constant 9.000000e+01 : f32
    %128 = vector.broadcast %cst_49 : f32 to vector<32x16xf32>
    %129 = arith.cmpf ogt, %127, %128 : vector<32x16xf32>
    %cst_50 = arith.constant 4.500000e+02 : f32
    %cst_51 = arith.constant 9.000000e+01 : f32
    %130 = vector.broadcast %cst_50 : f32 to vector<32x16xf32>
    %131 = vector.broadcast %cst_51 : f32 to vector<32x16xf32>
    %132 = arith.select %129, %130, %131 : vector<32x16xi1>, vector<32x16xf32>
    %133 = arith.subf %132, %127 : vector<32x16xf32>
    %c0_52 = arith.constant 0 : index
    %c0_53 = arith.constant 0 : index
    %134 = vector.load %arg5[%c0_52, %c0_53] : memref<32x16xf32, #tpu.memory_space<vmem>>, vector<32x16xf32>
    tpu.vector_store %arg5[%c0_52, %c0_53], %133 {strides = array<i32>} : memref<32x16xf32, #tpu.memory_space<vmem>>, vector<32x16xf32>,
    return
  }
  func.func @transform_0(%arg0: i32) -> (i32, i32) {
    %c0_i32 = arith.constant 0 : i32
    %c0_i32_0 = arith.constant 0 : i32
    %c0_i32_1 = arith.constant 0 : i32
    return %c0_i32, %c0_i32_0 : i32, i32
  }
  func.func @transform_1(%arg0: i32) -> (i32, i32) {
    %c0_i32 = arith.constant 0 : i32
    %c0_i32_0 = arith.constant 0 : i32
    %c0_i32_1 = arith.constant 0 : i32
    return %c0_i32, %c0_i32_0 : i32, i32
  }
  func.func @transform_2(%arg0: i32) -> i32 {
    %c0_i32 = arith.constant 0 : i32
    %c0_i32_0 = arith.constant 0 : i32
    return %c0_i32 : i32
  }
  func.func @transform_3(%arg0: i32) -> (i32, i32) {
    %c0_i32 = arith.constant 0 : i32
    %c0_i32_0 = arith.constant 0 : i32
    return %arg0, %c0_i32 : i32, i32
  }
  func.func @transform_4(%arg0: i32) -> (i32, i32) {
    %c0_i32 = arith.constant 0 : i32
    %c0_i32_0 = arith.constant 0 : i32
    return %arg0, %c0_i32 : i32, i32
  }
}

</mosaic_0001>

<bundles_post_ra>
// kernel: tpu_custom_call.1
= control target key start
LH: loop header
LB: loop body
LE: loop exit
PB: predicated region body
PF: predicated region fallthrough
CT: control target
= control target key end

     0   :  { %10 = vsyncpa [#allocation4], 0  ;;  %s1262_s0 = inlined_call_operand.vmem [shape: f32[3,3], index: 0, kind: input, shape index: {}]   ;;  %s1263_s1 = inlined_call_operand.vmem [shape: f32[3,3], index: 1, kind: input, shape index: {}]   ;;  %s1264_s2 = inlined_call_operand.<no memory space> [shape: f32[1], index: 2, kind: input, shape index: {}]   ;;  %s1265_s3 = inlined_call_operand.vmem [shape: f32[32,16], index: 3, kind: input, shape index: {}]   ;;  %s1266_s4 = inlined_call_operand.vmem [shape: f32[32,16], index: 4, kind: output, shape index: {}]  }
   0x1   :  { %s17_s17 = sshll.u32 %s1262_s0, 4  ;;  %s18_s17 = int_to_ptr.vmem [resolvable:$true] %s17_s17 }
   0x2   :  { %11 = vsyncpa [#allocation6], 0  ;;  %s26_s20 = sshll.u32 %s1263_s1, 4  ;;  %s756_s21 = smov [#allocation3]   ;;  %s27_s20 = int_to_ptr.vmem [resolvable:$true] %s26_s20 }
   0x3   :  { %20 = dma.vmem_to_smem %s18_s17, 64, %s756_s21, [#allocation4]  }
   0x4   :  { %s757_s22 = smov [#allocation5]  }
   0x5   :  { %29 = dma.vmem_to_smem %s27_s20, 64, %s757_s22, [#allocation6]  }
   0x6   :  { %752 = dma.done.wait [#allocation4], 64  }
   0x7   :  { %753 = vsyncadd [#allocation4], 4294967232 }
   0x8   :  { %754 = dma.done.wait [#allocation6], 64  }
   0x9   :  { %755 = vsyncadd [#allocation6], 4294967232 }
   0xa   :  { %42 = sfence }
   0xb   :  { %v797_v0 = vld [vmem:[%s1265_s3 + $0x10] sm:$0xff]  ;;  %v802_v1 = vld [vmem:[%s1265_s3 + $0x18] sm:$0xff]  ;;  %v47_v2 = vlaneseq  ;;  %vm112_vm0 = vcmask 1040384   ;;  %vm137_vm1 = vcmask 1046528   ;;  %s163_s1 = sld [smem:[#allocation3]]  ;;  %v810_v7 = vld [vmem:[%s1265_s3] sm:$0xff] }
   0xc   :  { %v116_v3 = vrot.slane %v797_v0, 7  ;;  %v118_v4 = vrot.slane %v802_v1, 7  ;;  %v143_v5 = vrot.slane %v802_v1, 1  ;;  %s697_s26 = sld [smem:[#allocation3 + $0x80]]  ;;  %v815_v8 = vld [vmem:[%s1265_s3 + $0x8] sm:$0xff]  ;;  %v113_v11 = vrot.slane %v810_v7, 7 }
   0xd   :  { %v48_v6 = vshrl.u32 %v47_v2, 7  ;;  %s698_s27 = sld [smem:[#allocation3 + $0x100]]  ;;  %v138_v12 = vrot.slane %v810_v7, 1  ;;  %v139_v15 = vrot.slane %v815_v8, 1  ;;  %v114_v18 = vrot.slane %v815_v8, 7  ;;  %s758_s9 = smov 1  }
   0xe   :  { %v818_v9 = vsel %vm112_vm0, %v116_v3, %v118_v4  ;;  %v149_v10 = vsel %vm137_vm1, %v143_v5, 0.0  ;;  %s702_s6 = sld [smem:[#allocation3 + $0x2]]  ;;  %v124_v17 = vsel %vm112_vm0, 0.0, %v113_v11  ;;  %v141_v19 = vrot.slane %v797_v0, 1  ;;  %s759_s12 = smov 127  }
   0xf   :  { %v51_v13 = vadd.s32 24, %v48_v6  ;;  %v56_v14 = vand.u32 15, %v48_v6  ;;  %s703_s7 = sld [smem:[#allocation3 + $0x82]]  ;;  %v49_v16 = vadd.s32 8, %v48_v6  ;;  %v50_v20 = vadd.s32 16, %v48_v6 }
  0x10   :  { %s704_s3 = sld [smem:[#allocation3 + $0x102]]  ;;  %v830_v23 = vsel %vm137_vm1, %v138_v12, %v139_v15  ;;  %v845_v43 = vsel %vm112_vm0, %v113_v11, %v114_v18  ;;  %v142_v44 = vsel %vm137_vm1, %v139_v15, %v141_v19  ;;  %v117_v52 = vsel %vm112_vm0, %v114_v18, %v116_v3 }
  0x11   :  { %v77_v21 = vand.u32 15, %v51_v13  ;;  %v164_v22 = vstv %s163_s1  ;;  %vm100_vm2 = vcmp.eq.s32.totalorder %v56_v14, 0  ;;  %v63_v27 = vand.u32 15, %v49_v16  ;;  %s852_s8 = sld [smem:[#allocation5]] }
  0x12   :  { %v168_v24 = vmul.f32 %v164_v22, %v818_v9  ;;  %v170_v25 = vstv %s697_s26  ;;  %v833_v26 = vsel %vm100_vm2, 0.0, %v124_v17  ;;  %v166_v48 = vmul.f32 %v164_v22, %v845_v43  ;;  %s705_s10 = sld [smem:[#allocation5 + $0x80]] }
  0x13   :  { %vm107_vm3 = vcmp.eq.s32.totalorder %v77_v21, 15  ;;  %v174_v28 = vmul.f32 %v170_v25, %v802_v1  ;;  %v180_v29 = vstv %s698_s27  ;;  %v165_v30 = vmul.f32 %v164_v22, %v833_v26  ;;  %s706_s11 = sld [smem:[#allocation5 + $0x100]] }
  0x14   :  { %v837_v31 = vsel %vm107_vm3, 0.0, %v149_v10  ;;  %v171_v32 = vmul.f32 %v170_v25, %v810_v7  ;;  %v181_v33 = vmul.f32 %v180_v29, %v830_v23  ;;  %v216_v34 = vstv %s702_s6  ;;  %s710_s13 = sld [smem:[#allocation5 + $0x2]] }
  0x15   :  { %v178_v35 = vadd.f32 %v174_v28, %v168_v24  ;;  %v184_v36 = vmul.f32 %v180_v29, %v837_v31  ;;  %v220_v37 = vmul.f32 %v216_v34, %v818_v9  ;;  %v222_v38 = vstv %s703_s7  ;;  %s711_s14 = sld [smem:[#allocation5 + $0x82]] }
  0x16   :  { %v175_v39 = vadd.f32 %v171_v32, %v165_v30  ;;  %v226_v40 = vmul.f32 %v222_v38, %v802_v1  ;;  %v232_v41 = vstv %s704_s3  ;;  %vm105_vm4 = vcmp.eq.s32.totalorder %v63_v27, 15  ;;  %s712_s15 = sld [smem:[#allocation5 + $0x102]] }
  0x17   :  { %v188_v42 = vadd.f32 %v184_v36, %v178_v35  ;;  %v236_v46 = vmul.f32 %v232_v41, %v837_v31  ;;  %v849_v47 = vsel %vm105_vm4, 0.0, %v142_v44  ;;  %v172_v50 = vmul.f32 %v170_v25, %v815_v8  ;;  %s699_s16 = sld [smem:[#allocation3 + $0x1]] }
  0x18   :  { %v185_v45 = vadd.f32 %v181_v33, %v175_v39  ;;  %v230_v49 = vadd.f32 %v226_v40, %v220_v37  ;;  %v70_v51 = vand.u32 15, %v50_v20  ;;  %v182_v53 = vmul.f32 %v180_v29, %v849_v47  ;;  %s700_s17 = sld [smem:[#allocation3 + $0x81]] }
  0x19   :  { %334 = vrot.lane.b32.xlu1 %v188_v42, %s758_s9  ;;  %v176_v54 = vadd.f32 %v172_v50, %v166_v48  ;;  %v217_v56 = vmul.f32 %v216_v34, %v833_v26  ;;  %v223_v57 = vmul.f32 %v222_v38, %v810_v7  ;;  %v233_v58 = vmul.f32 %v232_v41, %v830_v23  ;;  %s701_s18 = sld [smem:[#allocation3 + $0x101]] }
  0x1a   :  { %328 = vrot.lane.b32.xlu0 %v185_v45, %s758_s9  ;;  %vm102_vm5 = vcmp.eq.s32.totalorder %v70_v51, 0  ;;  %v240_v59 = vadd.f32 %v236_v46, %v230_v49  ;;  %v867_v60 = vsel %vm137_vm1, %v141_v19, %v143_v5  ;;  %v173_v62 = vmul.f32 %v170_v25, %v797_v0  ;;  %s707_s19 = sld [smem:[#allocation5 + $0x1]] }
  0x1b   :  { %v859_v55 = vsel %vm102_vm5, 0.0, %v117_v52  ;;  %v186_v63 = vadd.f32 %v182_v53, %v176_v54  ;;  %v225_v3 = vmul.f32 %v222_v38, %v797_v0  ;;  %v227_v4 = vadd.f32 %v223_v57, %v217_v56  ;;  %s708_s20 = sld [smem:[#allocation5 + $0x81]] }
  0x1c   :  { %v167_v61 = vmul.f32 %v164_v22, %v859_v55  ;;  %v219_v2 = vmul.f32 %v216_v34, %v859_v55  ;;  %v183_v6 = vmul.f32 %v180_v29, %v867_v60  ;;  %v235_v10 = vmul.f32 %v232_v41, %v867_v60  ;;  %s709_s21 = sld [smem:[#allocation5 + $0x101]] }
  0x1d   :  { %v237_v11 = vadd.f32 %v233_v58, %v227_v4  ;;  %v242_v12 = vstv %s852_s8  ;;  %v248_v13 = vstv %s705_s10  ;;  %v218_v14 = vmul.f32 %v216_v34, %v845_v43 }
  0x1e   :  { %v177_v5 = vadd.f32 %v173_v62, %v167_v61  ;;  %v229_v15 = vadd.f32 %v225_v3, %v219_v2  ;;  %v224_v16 = vmul.f32 %v222_v38, %v815_v8  ;;  %v234_v17 = vmul.f32 %v232_v41, %v849_v47 }
  0x1f   :  { %353 = vrot.lane.b32.xlu2 %v237_v11, %s759_s12  ;;  %v245_v18 = vmul.f32 %v242_v12, %v859_v55  ;;  %v251_v19 = vmul.f32 %v248_v13, %v797_v0  ;;  %v258_v22 = vstv %s706_s11  ;;  %v244_v24 = vmul.f32 %v242_v12, %v845_v43 }
  0x20   :  { %v228_v20 = vadd.f32 %v224_v16, %v218_v14  ;;  %v187_v21 = vadd.f32 %v183_v6, %v177_v5  ;;  %v250_v25 = vmul.f32 %v248_v13, %v815_v8  ;;  %v239_v27 = vadd.f32 %v235_v10, %v229_v15 }
  0x21   :  { %359 = vrot.lane.b32.xlu1 %v240_v59, %s759_s12  ;;  %v243_v29 = vmul.f32 %v242_v12, %v833_v26  ;;  %v249_v30 = vmul.f32 %v248_v13, %v810_v7  ;;  %v255_v32 = vadd.f32 %v251_v19, %v245_v18  ;;  %v261_v33 = vmul.f32 %v258_v22, %v867_v60 }
  0x22   :  { %330 = vrot.lane.b32.xlu0 %v186_v63, %s758_s9  ;;  %v238_v28 = vadd.f32 %v234_v17, %v228_v20  ;;  %v254_v34 = vadd.f32 %v250_v25, %v244_v24  ;;  %v260_v35 = vmul.f32 %v258_v22, %v849_v47  ;;  %v294_v36 = vstv %s710_s13 }
  0x23   :  { %v300_v37 = vstv %s711_s14  ;;  %v253_v38 = vadd.f32 %v249_v30, %v243_v29  ;;  %v259_v39 = vmul.f32 %v258_v22, %v830_v23  ;;  %v265_v40 = vadd.f32 %v261_v33, %v255_v32 }
  0x24   :  { %v296_v41 = vmul.f32 %v294_v36, %v845_v43  ;;  %v264_v42 = vadd.f32 %v260_v35, %v254_v34  ;;  %v302_v44 = vmul.f32 %v300_v37, %v815_v8  ;;  %v310_v45 = vstv %s712_s15 }
  0x25   :  { %v295_v46 = vmul.f32 %v294_v36, %v833_v26  ;;  %v301_v48 = vmul.f32 %v300_v37, %v810_v7  ;;  %v263_v49 = vadd.f32 %v259_v39, %v253_v38  ;;  %v246_v50 = vmul.f32 %v242_v12, %v818_v9 }
  0x26   :  { %v252_v51 = vmul.f32 %v248_v13, %v802_v1  ;;  %v306_v52 = vadd.f32 %v302_v44, %v296_v41  ;;  %v312_v53 = vmul.f32 %v310_v45, %v849_v47  ;;  %v311_v54 = vmul.f32 %v310_v45, %v830_v23 }
  0x27   :  { %355 = vrot.lane.b32.xlu2 %v238_v28, %s759_s12  ;;  %v305_v56 = vadd.f32 %v301_v48, %v295_v46  ;;  %v262_v58 = vmul.f32 %v258_v22, %v837_v31  ;;  %v298_v61 = vmul.f32 %v294_v36, %v818_v9  ;;  %v304_v62 = vmul.f32 %v300_v37, %v802_v1 }
  0x28   :  { %v256_v57 = vadd.f32 %v252_v51, %v246_v50  ;;  %v316_v59 = vadd.f32 %v312_v53, %v306_v52  ;;  %v297_v3 = vmul.f32 %v294_v36, %v859_v55  ;;  %v303_v4 = vmul.f32 %v300_v37, %v797_v0 }
  0x29   :  { %332 = vrot.lane.b32.xlu1 %v187_v21, %s758_s9  ;;  %v315_v63 = vadd.f32 %v311_v54, %v305_v56  ;;  %v314_v6 = vmul.f32 %v310_v45, %v837_v31  ;;  %v308_v10 = vadd.f32 %v304_v62, %v298_v61  ;;  %v313_v5 = vmul.f32 %v310_v45, %v867_v60 }
  0x2a   :  { %357 = vrot.lane.b32.xlu0 %v239_v27, %s759_s12  ;;  %v266_v2 = vadd.f32 %v262_v58, %v256_v57  ;;  %v307_v11 = vadd.f32 %v303_v4, %v297_v3  ;;  %v190_v17 = vstv %s699_s16  ;;  %v196_v18 = vstv %s700_s17 }
  0x2b   :  { %v318_v12 = vadd.f32 %v314_v6, %v308_v10  ;;  %v193_v21 = vmul.f32 %v190_v17, %v859_v55  ;;  %v199_v22 = vmul.f32 %v196_v18, %v797_v0  ;;  %v206_v24 = vstv %s701_s18 }
  0x2c   :  { %v317_v13 = vadd.f32 %v313_v5, %v307_v11  ;;  %v191_v25 = vmul.f32 %v190_v17, %v833_v26  ;;  %v197_v27 = vmul.f32 %v196_v18, %v810_v7  ;;  %v209_v29 = vmul.f32 %v206_v24, %v867_v60 }
  0x2d   :  { %v203_v28 = vadd.f32 %v199_v22, %v193_v21  ;;  %v192_v30 = vmul.f32 %v190_v17, %v845_v43  ;;  %v198_v32 = vmul.f32 %v196_v18, %v815_v8  ;;  %v268_v33 = vstv %s707_s19 }
  0x2e   :  { %v274_v34 = vstv %s708_s20  ;;  %v201_v36 = vadd.f32 %v197_v27, %v191_v25  ;;  %v207_v38 = vmul.f32 %v206_v24, %v830_v23  ;;  %v208_v44 = vmul.f32 %v206_v24, %v849_v47 }
  0x2f   :  { %382 = vrot.lane.b32.xlu2 %v263_v49, %s758_s9  ;;  %v213_v39 = vadd.f32 %v209_v29, %v203_v28  ;;  %v277_v41 = vmul.f32 %v274_v34, %v797_v0  ;;  %v284_v45 = vstv %s709_s21  ;;  %v194_v48 = vmul.f32 %v190_v17, %v818_v9 }
  0x30   :  { %v200_v49 = vmul.f32 %v196_v18, %v802_v1  ;;  %v945_v50 = vstv %s1264_s2  ;;  %v211_v51 = vadd.f32 %v207_v38, %v201_v36  ;;  %v287_v0 = vmul.f32 %v284_v45, %v867_v60 }
  0x31   :  { %386 = vrot.lane.b32.xlu1 %v265_v40, %s758_s9  ;;  %v271_v40 = vmul.f32 %v268_v33, %v859_v55  ;;  %v322_v55 = vadd.f32 %v945_v50, %v213_v39  ;;  %v269_v54 = vmul.f32 %v268_v33, %v833_v26  ;;  %v275_v56 = vmul.f32 %v274_v34, %v810_v7 }
  0x32   :  { %384 = vrot.lane.b32.xlu0 %v264_v42, %s758_s9  ;;  %v202_v42 = vadd.f32 %v198_v32, %v192_v30  ;;  %vm340_vm6 = vcmask 7168   ;;  %v270_v58 = vmul.f32 %v268_v33, %v845_v43  ;;  %vm365_vm7 = vcmask 121856  }
  0x33   :  { %v281_v52 = vadd.f32 %v277_v41, %v271_v40  ;;  %v210_v61 = vmul.f32 %v206_v24, %v837_v31  ;;  %v320_v60 = vadd.f32 %v945_v50, %v211_v51  ;;  %v279_v7 = vadd.f32 %v275_v56, %v269_v54 }
  0x34   :  { %v212_v53 = vadd.f32 %v208_v44, %v202_v42  ;;  %v285_v6 = vmul.f32 %v284_v45, %v830_v23  ;;  %v286_v5 = vmul.f32 %v284_v45, %v849_v47  ;;  %v272_v47 = vmul.f32 %v268_v33, %v818_v9 }
  0x35   :  { %v291_v4 = vadd.f32 %v287_v0, %v281_v52  ;;  %v288_v33 = vmul.f32 %v284_v45, %v837_v31 }
  0x36   :  { %v321_v26 = vadd.f32 %v945_v50, %v212_v53  ;;  %v289_v24 = vadd.f32 %v285_v6, %v279_v7 }
  0x37   :  { %388 = vrot.lane.b32.xlu2 %v266_v2, %s758_s9  ;;  %v204_v2 = vadd.f32 %v200_v49, %v194_v48 }
  0x39   :  { %408 = vrot.lane.b32.xlu1 %v316_v59, %s759_s12  ;;  %v276_v59 = vmul.f32 %v274_v34, %v815_v8  ;;  %v214_v21 = vadd.f32 %v210_v61, %v204_v2 }
  0x3a   :  { %406 = vrot.lane.b32.xlu0 %v315_v63, %s759_s12 }
  0x3b   :  { %v280_v11 = vadd.f32 %v276_v59, %v270_v58 }
  0x3d   :  { %v290_v29 = vadd.f32 %v286_v5, %v280_v11 }
  0x3f   :  { %410 = vrot.lane.b32.xlu2 %v317_v13, %s759_s12  ;;  %v376_v13 = vadd.f32 %v945_v50, %v291_v4 }
  0x42   :  { %412 = vrot.lane.b32.xlu0 %v318_v12, %s759_s12 }
  0x79   :  { %v917_v14 = vpop.permute.xlu2 %353 }
  0x7a   :  { %v366_v18 = vsel %vm365_vm7, %v917_v14, 0.0 }
  0x81   :  { %v919_v15 = vpop.permute.xlu2 %355 }
  0x82   :  { %v367_v25 = vsel %vm365_vm7, %v919_v15, 0.0 }
  0x89   :  { %v923_v20 = vpop.permute.xlu2 %382 }
  0x8a   :  { %v394_v49 = vsel %vm340_vm6, 0.0, %v923_v20 }
  0x8b   :  { %v921_v16 = vpop.permute.xlu1 %334 }
  0x8c   :  { %v329_v19 = vpop.permute.xlu0 %328  ;;  %v344_v15 = vsel %vm340_vm6, 0.0, %v921_v16 }
  0x8d   :  { %v341_v12 = vsel %vm340_vm6, 0.0, %v329_v19  ;;  %v278_v19 = vmul.f32 %v274_v34, %v802_v1  ;;  %v374_v1 = vadd.f32 %v945_v50, %v289_v24  ;;  %v375_v34 = vadd.f32 %v945_v50, %v290_v29 }
  0x8e   :  { %v345_v23 = vadd.f32 %v341_v12, %v320_v60 }
  0x8f   :  { %v282_v9 = vadd.f32 %v278_v19, %v272_v47  ;;  %v398_v56 = vadd.f32 %v394_v49, %v374_v1 }
  0x90   :  { %v370_v39 = vadd.f32 %v366_v18, %v345_v23 }
  0x91   :  { %v938_v46 = vpop.permute.xlu2 %388 }
  0x92   :  { %v1000_v45 = vsub.f32 0.0, %v370_v39 }
  0x93   :  { %v932_v35 = vpop.permute.xlu1 %359 }
  0x94   :  { %v331_v37 = vpop.permute.xlu0 %330  ;;  %v369_v52 = vsel %vm365_vm7, %v932_v35, 0.0  ;;  %v1023_v35 = vand.u32 2147483647, %v1000_v45  ;;  %vm477_vm1 = vcmp.ne.f32.partialorder %v1000_v45, %v1000_v45 }
  0x95   :  { %v342_v8 = vsel %vm340_vm6, 0.0, %v331_v37  ;;  %v323_v37 = vadd.f32 %v945_v50, %v214_v21 }
  0x96   :  { %v346_v22 = vadd.f32 %v342_v8, %v321_v26  ;;  %v397_v26 = vsel %vm340_vm6, 0.0, %v938_v46 }
  0x97   :  { %v348_v44 = vadd.f32 %v344_v15, %v323_v37 }
  0x98   :  { %v371_v38 = vadd.f32 %v367_v25, %v346_v22 }
  0x99   :  { %v411_v17 = vpop.permute.xlu2 %410 }
  0x9a   :  { %v420_v14 = vsel %vm365_vm7, %v411_v17, 0.0  ;;  %v992_v48 = vsub.f32 0.0, %v371_v38 }
  0x9b   :  { %v333_v57 = vpop.permute.xlu1 %332 }
  0x9c   :  { %v343_v62 = vsel %vm340_vm6, 0.0, %v333_v57  ;;  %v358_v63 = vpop.permute.xlu0 %357  ;;  %v292_v57 = vadd.f32 %v288_v33, %v282_v9  ;;  %v1017_v58 = vand.u32 2147483647, %v992_v48  ;;  %vm537_vm14 = vcmp.ne.f32.partialorder %v992_v48, %v992_v48 }
  0x9d   :  { %v347_v3 = vadd.f32 %v343_v62, %v322_v55  ;;  %v368_v43 = vsel %vm365_vm7, %v358_v63, 0.0  ;;  %v373_v62 = vadd.f32 %v369_v52, %v348_v44 }
  0x9e   :  { %v377_v60 = vadd.f32 %v945_v50, %v292_v57  ;;  %vm543_vm3 = vcmp.eq.s32.totalorder %v1017_v58, inf }
  0x9f   :  { %v372_v10 = vadd.f32 %v368_v43, %v347_v3  ;;  %v1058_v43 = vsub.f32 0.0, %v373_v62 }
  0xa0   :  { %v401_v12 = vadd.f32 %v397_v26, %v377_v60 }
  0xa1   :  { %v967_v27 = vsub.f32 0.0, %v372_v10  ;;  %v1079_v18 = vand.u32 2147483647, %v1058_v43 }
  0xa3   :  { %v387_v28 = vpop.permute.xlu1 %386  ;;  %v977_v40 = vand.u32 2147483647, %v967_v27  ;;  %vm597_vm8 = vcmp.ne.f32.partialorder %v967_v27, %v967_v27 }
  0xa4   :  { %v396_v30 = vsel %vm340_vm6, 0.0, %v387_v28  ;;  %v385_v32 = vpop.permute.xlu0 %384 }
  0xa5   :  { %v400_v36 = vadd.f32 %v396_v30, %v376_v13  ;;  %v395_v42 = vsel %vm340_vm6, 0.0, %v385_v32  ;;  %vm603_vm11 = vcmp.eq.s32.totalorder %v977_v40, inf  ;;  %vm483_vm6 = vcmp.eq.s32.totalorder %v1023_v35, inf }
  0xa6   :  { %v399_v0 = vadd.f32 %v395_v42, %v375_v34 }
  0xa7   :  { %v979_v41 = vadd.f32 %v420_v14, %v400_v36 }
  0xa9   :  { %v988_v16 = vand.u32 2147483647, %v979_v41  ;;  %vm598_vm9 = vcmp.ne.f32.partialorder %v979_v41, %v979_v41 }
  0xaa   :  { %vm996_vm10 = vmor %vm597_vm8, %vm598_vm9 }
  0xab   :  { %v1004_v51 = vmax.f32 %v977_v40, %v988_v16  ;;  %vm604_vm12 = vcmp.eq.s32.totalorder %v988_v16, inf  ;;  %v409_v55 = vpop.permute.xlu1 %408  ;;  %v552_v36 = vmin.f32 %v977_v40, %v988_v16 }
  0xac   :  { %vm1010_vm13 = vmand %vm603_vm11, %vm604_vm12  ;;  %v419_v53 = vsel %vm365_vm7, %v409_v55, 0.0  ;;  %v407_v54 = vpop.permute.xlu0 %406 }
  0xad   :  { %720 = vrcp.f32 %v1004_v51  ;;  %v1019_v59 = vadd.f32 %v419_v53, %v399_v0  ;;  %v418_v61 = vsel %vm365_vm7, %v407_v54, 0.0  ;;  %v565_v21 = vand.u32 2147483648, %v1004_v51 }
  0xae   :  { %v1025_v63 = vadd.f32 %v418_v61, %v398_v56  ;;  %v563_v23 = vand.u32 2147483647, %v1004_v51 }
  0xaf   :  { %v1028_v2 = vand.u32 2147483647, %v1019_v59  ;;  %vm538_vm15 = vcmp.ne.f32.partialorder %v1019_v59, %v1019_v59  ;;  %v566_v30 = vor.u32 1.1754944e-38, %v565_v21 }
  0xb0   :  { %vm1035_vm0 = vmor %vm537_vm14, %vm538_vm15  ;;  %v1042_v4 = vand.u32 2147483647, %v1025_v63  ;;  %vm478_vm2 = vcmp.ne.f32.partialorder %v1025_v63, %v1025_v63  ;;  %vm657_vm14 = vcmp.ne.f32.partialorder %v1058_v43, %v1058_v43  ;;  %vm559_vm15 = vweird.f32 %v1004_v51 }
  0xb1   :  { %v1050_v7 = vmax.f32 %v1017_v58, %v1028_v2  ;;  %vm544_vm4 = vcmp.eq.s32.totalorder %v1028_v2, inf  ;;  %vm1054_vm5 = vmor %vm477_vm1, %vm478_vm2  ;;  %v492_v0 = vmin.f32 %v1017_v58, %v1028_v2 }
  0xb2   :  { %vm1060_vm8 = vmand %vm543_vm3, %vm544_vm4  ;;  %v1067_v46 = vmax.f32 %v1023_v35, %v1042_v4  ;;  %vm484_vm9 = vcmp.eq.s32.totalorder %v1042_v4, inf  ;;  %vm663_vm3 = vcmp.eq.s32.totalorder %v1079_v18, inf  ;;  %vm564_vm4 = vcmp.eq.f32.partialorder %v563_v23, 8.507059e+37 }
  0xb3   :  { %v721_v6 = vpop.eup %720  ;;  %722 = vrcp.f32 %v1050_v7  ;;  %vm1072_vm11 = vmand %vm483_vm6, %vm484_vm9  ;;  %v503_v1 = vand.u32 2147483647, %v1050_v7  ;;  %v505_v33 = vand.u32 2147483648, %v1050_v7  ;;  %v432_v54 = vmin.f32 %v1023_v35, %v1042_v4 }
  0xb4   :  { %v555_v10 = vmul.f32 %v721_v6, %v1004_v51  ;;  %v413_v5 = vpop.permute.xlu0 %412  ;;  %724 = vrcp.f32 %v1067_v46  ;;  %vm560_vm12 = vweird.f32 %v721_v6  ;;  %v443_v42 = vand.u32 2147483647, %v1067_v46 }
  0xb5   :  { %v421_v17 = vsel %vm365_vm7, %v413_v5, 0.0  ;;  %vm561_vm2 = vmor %vm559_vm15, %vm560_vm12  ;;  %v445_v49 = vand.u32 2147483648, %v1067_v46  ;;  %v506_v57 = vor.u32 1.1754944e-38, %v505_v33 }
  0xb6   :  { %v556_v13 = vsub.f32 1.0, %v555_v10  ;;  %v1082_v22 = vadd.f32 %v421_v17, %v401_v12 }
  0xb7   :  { %v446_v26 = vor.u32 1.1754944e-38, %v445_v49 }
  0xb8   :  { %v557_v24 = vmul.f32 %v721_v6, %v556_v13  ;;  %v1088_v25 = vand.u32 2147483647, %v1082_v22  ;;  %vm658_vm7 = vcmp.ne.f32.partialorder %v1082_v22, %v1082_v22 }
  0xb9   :  { %v723_v28 = vpop.eup %722  ;;  %vm1093_vm1 = vmor %vm657_vm14, %vm658_vm7  ;;  %vm499_vm7 = vweird.f32 %v1050_v7 }
  0xba   :  { %v558_v29 = vadd.f32 %v721_v6, %v557_v24  ;;  %v725_v19 = vpop.eup %724  ;;  %v495_v32 = vmul.f32 %v723_v28, %v1050_v7  ;;  %v1101_v14 = vmax.f32 %v1079_v18, %v1088_v25  ;;  %vm500_vm6 = vweird.f32 %v723_v28 }
  0xbb   :  { %v435_v38 = vmul.f32 %v725_v19, %v1067_v46  ;;  %vm664_vm9 = vcmp.eq.s32.totalorder %v1088_v25, inf  ;;  %vm440_vm12 = vweird.f32 %v725_v19  ;;  %vm501_vm15 = vmor %vm499_vm7, %vm500_vm6 }
  0xbc   :  { %v562_v37 = vsel %vm561_vm2, %v721_v6, %v558_v29  ;;  %v496_v39 = vsub.f32 1.0, %v495_v32  ;;  %726 = vrcp.f32 %v1101_v14  ;;  %vm1120_vm14 = vmand %vm663_vm3, %vm664_vm9  ;;  %vm439_vm2 = vweird.f32 %v1067_v46 }
  0xbd   :  { %v567_v15 = vsel %vm564_vm4, %v566_v30, %v562_v37  ;;  %v436_v34 = vsub.f32 1.0, %v435_v38  ;;  %vm504_vm3 = vcmp.eq.f32.partialorder %v503_v1, 8.507059e+37  ;;  %vm441_vm4 = vmor %vm439_vm2, %vm440_vm12  ;;  %vm444_vm9 = vcmp.eq.f32.partialorder %v443_v42, 8.507059e+37 }
  0xbe   :  { %v1108_v9 = vmul.f32 %v567_v15, %v552_v36  ;;  %v497_v44 = vmul.f32 %v723_v28, %v496_v39  ;;  %v623_v23 = vand.u32 2147483647, %v1101_v14  ;;  %vm619_vm12 = vweird.f32 %v1101_v14 }
  0xbf   :  { %v437_v55 = vmul.f32 %v725_v19, %v436_v34  ;;  %v612_v39 = vmin.f32 %v1079_v18, %v1088_v25  ;;  %vm587_vm2 = vcmp.gt.f32.partialorder %v988_v16, %v977_v40  ;;  %v760_v40 = vmov 0.0  }
  0xc0   :  { %v1116_v51 = vmul.f32 %v1108_v9, %v1108_v9  ;;  %v498_v53 = vadd.f32 %v723_v28, %v497_v44 }
  0xc1   :  { %v438_v61 = vadd.f32 %v725_v19, %v437_v55 }
  0xc2   :  { %v570_v56 = vmul.f32 0.002785687, %v1116_v51  ;;  %v727_v62 = vpop.eup %726  ;;  %v502_v60 = vsel %vm501_vm15, %v723_v28, %v498_v53  ;;  %v625_v28 = vand.u32 2147483648, %v1101_v14  ;;  %vm624_vm15 = vcmp.eq.f32.partialorder %v623_v23, 8.507059e+37 }
  0xc3   :  { %v507_v10 = vsel %vm504_vm3, %v506_v57, %v502_v60  ;;  %v442_v5 = vsel %vm441_vm4, %v725_v19, %v438_v61  ;;  %v615_v7 = vmul.f32 %v727_v62, %v1101_v14  ;;  %vm620_vm6 = vweird.f32 %v727_v62 }
  0xc4   :  { %v571_v6 = vadd.f32 -0.015866, %v570_v56  ;;  %v1132_v12 = vmul.f32 %v507_v10, %v492_v0  ;;  %v447_v13 = vsel %vm444_vm9, %v446_v26, %v442_v5  ;;  %vm621_vm7 = vmor %vm619_vm12, %vm620_vm6  ;;  %v626_v1 = vor.u32 1.1754944e-38, %v625_v28 }
  0xc5   :  { %v1135_v21 = vmul.f32 %v447_v13, %v432_v54  ;;  %v616_v24 = vsub.f32 1.0, %v615_v7  ;;  %vm593_vm3 = vcmp.lt.s32.totalorder %v967_v27, 0  ;;  %vm470_vm4 = vcmp.lt.f32.partialorder %v1000_v45, 0.0 }
  0xc6   :  { %v572_v17 = vmul.f32 %v571_v6, %v1116_v51  ;;  %v1139_v46 = vmul.f32 %v1132_v12, %v1132_v12  ;;  %vm590_vm9 = vcmp.lt.f32.partialorder %v967_v27, 0.0  ;;  %v594_v16 = vsel %vm593_vm3, 3.1415927, %v760_v40 }
  0xc7   :  { %v1145_v19 = vmul.f32 %v1135_v21, %v1135_v21  ;;  %v617_v30 = vmul.f32 %v727_v62, %v616_v24  ;;  %vm595_vm6 = vcmp.eq.f32.partialorder %v979_v41, 0.0  ;;  %vm473_vm12 = vcmp.lt.s32.totalorder %v1000_v45, 0 }
  0xc8   :  { %v573_v29 = vadd.f32 0.04247222, %v572_v17  ;;  %v510_v32 = vmul.f32 0.002785687, %v1139_v46  ;;  %v761_v27 = vmov 0.7853982   ;;  %vm467_vm3 = vcmp.gt.f32.partialorder %v1042_v4, %v1023_v35 }
  0xc9   :  { %v450_v37 = vmul.f32 0.002785687, %v1145_v19  ;;  %v618_v38 = vadd.f32 %v727_v62, %v617_v30  ;;  %v474_v31 = vsel %vm473_vm12, 3.1415927, %v760_v40  ;;  %v762_v45 = vmov 90.0  }
  0xca   :  { %v574_v36 = vmul.f32 %v573_v29, %v1116_v51  ;;  %v511_v15 = vadd.f32 -0.015866, %v510_v32 }
  0xcb   :  { %v451_v34 = vadd.f32 -0.015866, %v450_v37  ;;  %v622_v42 = vsel %vm621_vm7, %v727_v62, %v618_v38  ;;  %vm533_vm7 = vcmp.lt.s32.totalorder %v992_v48, 0 }
  0xcc   :  { %v575_v33 = vadd.f32 -0.074975304, %v574_v36  ;;  %v512_v44 = vmul.f32 %v511_v15, %v1139_v46  ;;  %v627_v49 = vsel %vm624_vm15, %v626_v1, %v622_v42  ;;  %vm686_vm15 = vcmask 130048  }
  0xcd   :  { %v452_v0 = vmul.f32 %v451_v34, %v1145_v19  ;;  %v1156_v53 = vmul.f32 %v627_v49, %v612_v39 }
  0xce   :  { %v576_v55 = vmul.f32 %v575_v33, %v1116_v51  ;;  %v513_v14 = vadd.f32 0.04247222, %v512_v44 }
  0xcf   :  { %v453_v56 = vadd.f32 0.04247222, %v452_v0  ;;  %v1160_v57 = vmul.f32 %v1156_v53, %v1156_v53 }
  0xd0   :  { %v577_v54 = vadd.f32 0.1064488, %v576_v55  ;;  %v514_v61 = vmul.f32 %v513_v14, %v1139_v46 }
  0xd1   :  { %v454_v60 = vmul.f32 %v453_v56, %v1145_v19  ;;  %v630_v26 = vmul.f32 0.002785687, %v1160_v57 }
  0xd2   :  { %v578_v62 = vmul.f32 %v577_v54, %v1116_v51  ;;  %v515_v6 = vadd.f32 -0.074975304, %v514_v61 }
  0xd3   :  { %v455_v5 = vadd.f32 -0.074975304, %v454_v60  ;;  %v631_v7 = vadd.f32 -0.015866, %v630_v26 }
  0xd4   :  { %v579_v10 = vadd.f32 -0.14207031, %v578_v62  ;;  %v516_v13 = vmul.f32 %v515_v6, %v1139_v46 }
  0xd5   :  { %v456_v24 = vmul.f32 %v455_v5, %v1145_v19  ;;  %v632_v23 = vmul.f32 %v631_v7, %v1160_v57 }
  0xd6   :  { %v580_v17 = vmul.f32 %v579_v10, %v1116_v51  ;;  %v517_v28 = vadd.f32 0.1064488, %v516_v13 }
  0xd7   :  { %v457_v30 = vadd.f32 0.1064488, %v456_v24  ;;  %v633_v32 = vadd.f32 0.04247222, %v632_v23 }
  0xd8   :  { %v581_v29 = vadd.f32 0.19993454, %v580_v17  ;;  %v518_v36 = vmul.f32 %v517_v28, %v1139_v46 }
  0xd9   :  { %v458_v38 = vmul.f32 %v457_v30, %v1145_v19  ;;  %v634_v15 = vmul.f32 %v633_v32, %v1160_v57 }
  0xda   :  { %v582_v37 = vmul.f32 %v581_v29, %v1116_v51  ;;  %v519_v39 = vadd.f32 -0.14207031, %v518_v36 }
  0xdb   :  { %v459_v33 = vadd.f32 -0.14207031, %v458_v38  ;;  %v635_v34 = vadd.f32 -0.074975304, %v634_v15 }
  0xdc   :  { %v583_v1 = vadd.f32 -0.33333147, %v582_v37  ;;  %v520_v42 = vmul.f32 %v519_v39, %v1139_v46  ;;  %v602_v37 = vsel %vm590_vm9, 2.3561945, %v761_v27 }
  0xdd   :  { %v460_v49 = vmul.f32 %v459_v33, %v1145_v19  ;;  %v636_v55 = vmul.f32 %v635_v34, %v1160_v57  ;;  %v608_v33 = vand.u32 2147483648, %v979_v41  ;;  %v534_v41 = vsel %vm533_vm7, 3.1415927, %v760_v40 }
  0xde   :  { %v584_v44 = vmul.f32 %v583_v1, %v1116_v51  ;;  %v521_v0 = vadd.f32 0.19993454, %v520_v42 }
  0xdf   :  { %v461_v54 = vadd.f32 0.19993454, %v460_v49  ;;  %v637_v56 = vadd.f32 0.1064488, %v636_v55 }
  0xe0   :  { %v585_v14 = vmul.f32 %v584_v44, %v1108_v9  ;;  %v522_v61 = vmul.f32 %v521_v0, %v1139_v46 }
  0xe1   :  { %v462_v60 = vmul.f32 %v461_v54, %v1145_v19  ;;  %v638_v26 = vmul.f32 %v637_v56, %v1160_v57 }
  0xe2   :  { %v586_v62 = vadd.f32 %v585_v14, %v1108_v9  ;;  %v523_v6 = vadd.f32 -0.33333147, %v522_v61 }
  0xe3   :  { %v463_v51 = vadd.f32 -0.33333147, %v462_v60  ;;  %v639_v5 = vadd.f32 -0.14207031, %v638_v26 }
  0xe4   :  { %v588_v10 = vsub.f32 1.5707964, %v586_v62  ;;  %v524_v7 = vmul.f32 %v523_v6, %v1139_v46 }
  0xe5   :  { %v464_v17 = vmul.f32 %v463_v51, %v1145_v19  ;;  %v640_v9 = vmul.f32 %v639_v5, %v1160_v57 }
  0xe6   :  { %v589_v13 = vsel %vm587_vm2, %v588_v10, %v586_v62  ;;  %v525_v23 = vmul.f32 %v524_v7, %v1132_v12  ;;  %vm527_vm2 = vcmp.gt.f32.partialorder %v1028_v2, %v1017_v58  ;;  %v482_v58 = vsel %vm470_vm4, 2.3561945, %v761_v27 }
  0xe7   :  { %v591_v24 = vsub.f32 3.1415927, %v589_v13  ;;  %v465_v28 = vmul.f32 %v464_v17, %v1135_v21  ;;  %v641_v29 = vadd.f32 0.19993454, %v640_v9  ;;  %v548_v62 = vand.u32 2147483648, %v1019_v59 }
  0xe8   :  { %v526_v19 = vadd.f32 %v525_v23, %v1132_v12 }
  0xe9   :  { %v592_v46 = vsel %vm590_vm9, %v591_v24, %v589_v13  ;;  %v466_v32 = vadd.f32 %v465_v28, %v1135_v21  ;;  %v642_v36 = vmul.f32 %v641_v29, %v1160_v57  ;;  %vm475_vm9 = vcmp.eq.f32.partialorder %v1025_v63, 0.0 }
  0xea   :  { %v596_v30 = vsel %vm595_vm6, %v594_v16, %v592_v46  ;;  %v528_v15 = vsub.f32 1.5707964, %v526_v19 }
  0xeb   :  { %v600_v38 = vsel %vm996_vm10, nan, %v596_v30  ;;  %v468_v12 = vsub.f32 1.5707964, %v466_v32  ;;  %v643_v1 = vadd.f32 -0.33333147, %v642_v36  ;;  %vm530_vm10 = vcmp.lt.f32.partialorder %v992_v48, 0.0 }
  0xec   :  { %v606_v39 = vsel %vm1010_vm13, %v602_v37, %v600_v38  ;;  %v529_v34 = vsel %vm527_vm2, %v528_v15, %v526_v19  ;;  %vm535_vm13 = vcmp.eq.f32.partialorder %v1019_v59, 0.0  ;;  %v542_v14 = vsel %vm530_vm10, 2.3561945, %v761_v27 }
  0xed   :  { %v607_v21 = vand.u32 2147483647, %v606_v39  ;;  %v531_v42 = vsub.f32 3.1415927, %v529_v34  ;;  %v469_v44 = vsel %vm467_vm3, %v468_v12, %v466_v32  ;;  %v644_v20 = vmul.f32 %v643_v1, %v1160_v57 }
  0xee   :  { %v471_v49 = vsub.f32 3.1415927, %v469_v44 }
  0xef   :  { %v609_v2 = vor.u32 %v608_v33, %v607_v21  ;;  %v532_v35 = vsel %vm530_vm10, %v531_v42, %v529_v34  ;;  %v645_v4 = vmul.f32 %v644_v20, %v1156_v53 }
  0xf0   :  { %v536_v0 = vsel %vm535_vm13, %v534_v41, %v532_v35  ;;  %v472_v57 = vsel %vm470_vm4, %v471_v49, %v469_v44 }
  0xf1   :  { %v672_v55 = vmul.f32 57.29578, %v609_v2  ;;  %v540_v54 = vsel %vm1035_vm0, nan, %v536_v0  ;;  %v476_v56 = vsel %vm475_vm9, %v474_v31, %v472_v57  ;;  %v646_v48 = vadd.f32 %v645_v4, %v1156_v53 }
  0xf2   :  { %v546_v61 = vsel %vm1060_vm8, %v542_v14, %v540_v54  ;;  %v480_v60 = vsel %vm1054_vm5, nan, %v476_v56  ;;  %v488_v53 = vand.u32 2147483648, %v1025_v63  ;;  %vm647_vm0 = vcmp.gt.f32.partialorder %v1088_v25, %v1079_v18 }
  0xf3   :  { %vm676_vm6 = vcmp.gt.f32.partialorder %v672_v55, 90.0  ;;  %v547_v6 = vand.u32 2147483647, %v546_v61  ;;  %v486_v10 = vsel %vm1072_vm11, %v482_v58, %v480_v60  ;;  %v648_v3 = vsub.f32 1.5707964, %v646_v48 }
  0xf4   :  { %v680_v26 = vsel %vm676_vm6, 450.0, %v762_v45  ;;  %v487_v5 = vand.u32 2147483647, %v486_v10  ;;  %vm653_vm8 = vcmp.lt.s32.totalorder %v1058_v43, 0  ;;  %vm650_vm5 = vcmp.lt.f32.partialorder %v1058_v43, 0.0 }
  0xf5   :  { %v684_v51 = vsub.f32 %v680_v26, %v672_v55  ;;  %v549_v59 = vor.u32 %v548_v62, %v547_v6  ;;  %v649_v8 = vsel %vm647_vm0, %v648_v3, %v646_v48  ;;  %v654_v13 = vsel %vm653_vm8, 3.1415927, %v760_v40 }
  0xf6   :  { %v489_v50 = vor.u32 %v488_v53, %v487_v5  ;;  %v651_v11 = vsub.f32 3.1415927, %v649_v8  ;;  %vm655_vm11 = vcmp.eq.f32.partialorder %v1082_v22, 0.0  ;;  %v662_v25 = vsel %vm650_vm5, 2.3561945, %v761_v27 }
  0xf7   :  { %689 = vst.msk [vmem:[%s1266_s4 + $0x10] sm:$0xff] %vm686_vm15, %v684_v51  ;;  %v671_v7 = vmul.f32 57.29578, %v549_v59  ;;  %v668_v40 = vand.u32 2147483648, %v1082_v22 }
  0xf8   :  { %v670_v63 = vmul.f32 57.29578, %v489_v50  ;;  %v652_v17 = vsel %vm650_vm5, %v651_v11, %v649_v8 }
  0xf9   :  { %vm675_vm4 = vcmp.gt.f32.partialorder %v671_v7, 90.0  ;;  %v656_v18 = vsel %vm655_vm11, %v654_v13, %v652_v17 }
  0xfa   :  { %v679_v9 = vsel %vm675_vm4, 450.0, %v762_v45  ;;  %vm674_vm12 = vcmp.gt.f32.partialorder %v670_v63, 90.0  ;;  %v660_v24 = vsel %vm1093_vm1, nan, %v656_v18 }
  0xfb   :  { %v683_v23 = vsub.f32 %v679_v9, %v671_v7  ;;  %v678_v28 = vsel %vm674_vm12, 450.0, %v762_v45  ;;  %v666_v43 = vsel %vm1120_vm14, %v662_v25, %v660_v24 }
  0xfc   :  { %v682_v29 = vsub.f32 %v678_v28, %v670_v63  ;;  %v667_v16 = vand.u32 2147483647, %v666_v43 }
  0xfd   :  { %688 = vst.msk [vmem:[%s1266_s4 + $0x8] sm:$0xff] %vm686_vm15, %v683_v23 }
  0xfe   :  { %687 = vst.msk [vmem:[%s1266_s4] sm:$0xff] %vm686_vm15, %v682_v29  ;;  %v669_v47 = vor.u32 %v668_v40, %v667_v16 }
 0x100   :  { %v673_v46 = vmul.f32 57.29578, %v669_v47 }
 0x102   :  { %vm677_vm1 = vcmp.gt.f32.partialorder %v673_v46, 90.0 }
 0x103   :  { %v681_v19 = vsel %vm677_vm1, 450.0, %v762_v45 }
 0x104   :  { %v685_v52 = vsub.f32 %v681_v19, %v673_v46 }
 0x106   :  { %690 = vst.msk [vmem:[%s1266_s4 + $0x18] sm:$0xff] %vm686_vm15, %v685_v52 }
 0x107   :  { %695 = vsyncpa [#allocation4], 1 }
 0x108   :  { %696 = vsyncpa [#allocation6], 1 }

</bundles_post_ra>
